<compile_context>
chip_gen: v6e
topology: v6e:2x2x1
jax: 0.10.0
libtpu: 0.0.40
codegen_flags: <defaults>
</compile_context>

<pallas_src>
import functools

import jax
import jax.numpy as jnp
from jax import lax
from jax.experimental import pallas as pl
from jax.experimental.pallas import tpu as pltpu

EPS = 1e-5
LANES = 128
# Above default scoped VMEM (16 MiB v5e / 32 MiB v6e+v7x), below v7x's 64 MiB physical,
# so the row tile can be raised for real problem sizes without recompiling flags.
VMEM_LIMIT_BYTES = 48 * 1024 * 1024


def _round_up(x, m):
    return (x + m - 1) // m * m


# ---------------------------------------------------------------------------
# Pass 1: conv-as-matmul + per-channel sum / sum-of-squares accumulation.
# ---------------------------------------------------------------------------
def conv_stats_kernel(p_ref, w_ref, z_ref, sum_ref, sq_ref):
    # MXU matmul: bf16 operands, f32 accumulation (BN statistics stay in f32).
    z = jnp.dot(p_ref[...], w_ref[...], preferred_element_type=jnp.float32)
    z_ref[...] = z

    part_sum = jnp.sum(z, axis=0, keepdims=True)      # (1, O_pad)
    part_sq = jnp.sum(z * z, axis=0, keepdims=True)   # (1, O_pad)

    # sum_ref / sq_ref map to the same (1, O_pad) block at every grid step, so they stay
    # VMEM-resident across the sequential ("arbitrary") M-tile axis (accumulator pattern).
    @pl.when(pl.program_id(0) == 0)
    def _init():
        sum_ref[...] = part_sum
        sq_ref[...] = part_sq

    @pl.when(pl.program_id(0) > 0)
    def _acc():
        sum_ref[...] += part_sum
        sq_ref[...] += part_sq


# ---------------------------------------------------------------------------
# Pass 2: folded BatchNorm affine — one FMA per element, lane-dense stores.
# ---------------------------------------------------------------------------
def bn_apply_kernel(z_ref, scale_ref, shift_ref, o_ref):
    o_ref[...] = (z_ref[...] * scale_ref[...] + shift_ref[...]).astype(o_ref.dtype)


def im2col_nhwc(x_nhwc, kh, kw, stride, padding):
    xp = jnp.pad(x_nhwc, ((0, 0), (padding, padding), (padding, padding), (0, 0)))
    n, hp, wp, c = xp.shape
    oh = (hp - kh) // stride + 1
    ow = (wp - kw) // stride + 1
    cols = []
    for i in range(kh):
        for j in range(kw):
            cols.append(xp[:, i:i + stride * oh:stride, j:j + stride * ow:stride, :])
    patches = jnp.concatenate(cols, axis=-1)          # (N, OH, OW, kh*kw*C)
    return patches.reshape(n * oh * ow, kh * kw * c), oh, ow


def cnn_block_forward(x_nchw, weight, bias, gamma, beta, *, stride, padding, tm=256):
    """weight: (O, C, kH, kW) PyTorch layout; x: (N, C, H, W); returns NCHW float32."""
    o_ch, c, kh, kw = weight.shape
    n = x_nchw.shape[0]

    # --- im2col (plain-JAX glue) ---
    x_nhwc = jnp.transpose(x_nchw, (0, 2, 3, 1))
    patches, oh, ow = im2col_nhwc(x_nhwc, kh, kw, stride, padding)   # (M, K) f32
    m_rows, k_dim = patches.shape

    # --- padding: lane-dense channel axis + M rounded to the row tile ---
    o_pad = _round_up(max(o_ch, LANES), LANES)
    tm = min(tm, _round_up(m_rows, 16))               # don't over-pad tiny inputs
    m_pad = _round_up(m_rows, tm)
    num_tiles = m_pad // tm

    # bf16 MXU operands (zero-padded rows/cols contribute exactly 0 to conv and stats).
    patches_p = jnp.zeros((m_pad, k_dim), jnp.float32).at[:m_rows].set(patches)
    patches_p = patches_p.astype(jnp.bfloat16)
    w_mat = jnp.transpose(weight, (2, 3, 1, 0)).reshape(k_dim, o_ch)  # matches im2col order
    w_p = jnp.zeros((k_dim, o_pad), jnp.float32).at[:, :o_ch].set(w_mat).astype(jnp.bfloat16)

    # --- pass 1: conv + batch statistics (reduction axis is the only/last grid axis) ---
    z, col_sum, col_sq = pl.pallas_call(
        conv_stats_kernel,
        out_shape=(
            jax.ShapeDtypeStruct((m_pad, o_pad), jnp.float32),
            jax.ShapeDtypeStruct((1, o_pad), jnp.float32),
            jax.ShapeDtypeStruct((1, o_pad), jnp.float32),
        ),
        grid=(num_tiles,),
        in_specs=[
            pl.BlockSpec((tm, k_dim), lambda i: (i, 0)),
            pl.BlockSpec((k_dim, o_pad), lambda i: (0, 0)),
        ],
        out_specs=(
            pl.BlockSpec((tm, o_pad), lambda i: (i, 0)),
            pl.BlockSpec((1, o_pad), lambda i: (0, 0)),
            pl.BlockSpec((1, o_pad), lambda i: (0, 0)),
        ),
        compiler_params=pltpu.CompilerParams(
            dimension_semantics=("arbitrary",),       # stats accumulator is revisited
            vmem_limit_bytes=VMEM_LIMIT_BYTES,
        ),
        cost_estimate=pl.CostEstimate(
            flops=2 * m_pad * k_dim * o_pad + 4 * m_pad * o_pad,
            transcendentals=0,
            bytes_accessed=(m_pad * k_dim * 2 + k_dim * o_pad * 2
                            + m_pad * o_pad * 4 + 2 * o_pad * 4),
        ),
    )(patches_p, w_p)

    # --- finalize BN stats in plain JAX (O_pad-sized vectors; all f32) ---
    bias_p = jnp.zeros((o_pad,), jnp.float32).at[:o_ch].set(bias)
    gamma_p = jnp.zeros((o_pad,), jnp.float32).at[:o_ch].set(gamma)
    beta_p = jnp.zeros((o_pad,), jnp.float32).at[:o_ch].set(beta)

    mean_z = col_sum[0] / m_rows                                  # pad rows contribute 0
    var = jnp.maximum(col_sq[0] / m_rows - mean_z * mean_z, 0.0)  # biased var (train mode)
    inv_std = lax.rsqrt(var + EPS)
    mean_y = mean_z + bias_p                       # conv bias shifts the batch mean only
    scale = gamma_p * inv_std
    shift = beta_p + (bias_p - mean_y) * scale     # == beta - mean_z*scale (bias cancels)
    scale = scale.reshape(1, o_pad)
    shift = shift.reshape(1, o_pad)

    # --- pass 2: y = z * scale + shift (independent row tiles -> megacore-shardable) ---
    out_flat = pl.pallas_call(
        bn_apply_kernel,
        out_shape=jax.ShapeDtypeStruct((m_pad, o_pad), jnp.float32),
        grid=(num_tiles,),
        in_specs=[
            pl.BlockSpec((tm, o_pad), lambda i: (i, 0)),
            pl.BlockSpec((1, o_pad), lambda i: (0, 0)),
            pl.BlockSpec((1, o_pad), lambda i: (0, 0)),
        ],
        out_specs=pl.BlockSpec((tm, o_pad), lambda i: (i, 0)),
        compiler_params=pltpu.CompilerParams(
            dimension_semantics=("parallel",),
            vmem_limit_bytes=VMEM_LIMIT_BYTES,
        ),
        cost_estimate=pl.CostEstimate(
            flops=2 * m_pad * o_pad,
            transcendentals=0,
            bytes_accessed=2 * m_pad * o_pad * 4 + 2 * o_pad * 4,
        ),
    )(z, scale, shift)

    # (M, O_pad) -> drop padding -> (N, OH, OW, O) -> NCHW
    out = out_flat[:m_rows, :o_ch].reshape(n, oh, ow, o_ch)
    return jnp.transpose(out, (0, 3, 1, 2))


def reference_forward(x_nchw, weight, bias, gamma, beta, stride, padding,
                      conv_dtype=jnp.float32):
    y = lax.conv_general_dilated(
        x_nchw.astype(conv_dtype), weight.astype(conv_dtype),
        window_strides=(stride, stride),
        padding=((padding, padding), (padding, padding)),
        dimension_numbers=("NCHW", "OIHW", "NCHW"),
        preferred_element_type=jnp.float32,
    ) + bias.reshape(1, -1, 1, 1)
    mean = jnp.mean(y, axis=(0, 2, 3), keepdims=True)
    var = jnp.mean((y - mean) ** 2, axis=(0, 2, 3), keepdims=True)
    return (y - mean) * lax.rsqrt(var + EPS) * gamma.reshape(1, -1, 1, 1) \
        + beta.reshape(1, -1, 1, 1)


if __name__ == "__main__":
    # Module config: CNN_Block(in_channels=4, out_channels=8, kernel_size=3, stride=1,
    #                          padding=1, norm='batch_norm', drop_out=0)
    N, C, H, W = 2, 4, 16, 16
    O, KH, KW = 8, 3, 3
    stride, padding = 1, 1

    key = jax.random.PRNGKey(0)
    kx, kw_, kb = jax.random.split(key, 3)
    x = jax.random.normal(kx, (N, C, H, W), dtype=jnp.float32)

    # Deterministic synthetic parameters (shapes match torch.nn.Conv2d / BatchNorm2d).
    fan_in = C * KH * KW
    bound = 1.0 / (fan_in ** 0.5)
    weight = jax.random.uniform(kw_, (O, C, KH, KW), jnp.float32, -bound, bound)
    bias = jax.random.uniform(kb, (O,), jnp.float32, -bound, bound)
    gamma = jnp.ones((O,), jnp.float32)   # BatchNorm2d affine init
    beta = jnp.zeros((O,), jnp.float32)

    fwd = jax.jit(functools.partial(cnn_block_forward, stride=stride, padding=padding))
    out = jax.block_until_ready(fwd(x, weight, bias, gamma, beta))
    assert out.shape == (N, O, H, W), out.shape

    # Apples-to-apples: reference using the same bf16 MXU operands (f32 accumulation).
    ref_bf16 = reference_forward(x, weight, bias, gamma, beta, stride, padding,
                                 conv_dtype=jnp.bfloat16)
    assert jnp.allclose(out, ref_bf16, atol=2e-3, rtol=2e-3), \
        float(jnp.max(jnp.abs(out - ref_bf16)))

    # Sanity bound vs full-f32 math: only bf16 operand-rounding noise should remain.
    ref_f32 = reference_forward(x, weight, bias, gamma, beta, stride, padding)
    assert jnp.allclose(out, ref_f32, atol=1e-1, rtol=1e-1), \
        float(jnp.max(jnp.abs(out - ref_f32)))

    print("KERNEL_OK")
</pallas_src>

<mosaic_0001>
module attributes {stable_mosaic.version = 11 : i64} {
  func.func @conv_stats_kernel(%arg0: i32, %arg1: memref<256x36xbf16, #tpu.memory_space<vmem>>, %arg2: memref<36x128xbf16, #tpu.memory_space<vmem>>, %arg3: memref<256x128xf32, #tpu.memory_space<vmem>>, %arg4: memref<1x128xf32, #tpu.memory_space<vmem>>, %arg5: memref<1x128xf32, #tpu.memory_space<vmem>>) attributes {dimension_semantics = [#tpu.dimension_semantics<arbitrary>], iteration_bounds = array<i64: 2>, scalar_prefetch = 0 : i64, scratch_operands = 0 : i64, tpu.core_type = #tpu.core_type<tc>, window_params = [{transform_indices = @transform_0, window_bounds = array<i64: 256, 36>}, {pipeline_mode = #tpu.pipeline_mode<synchronous>, transform_indices = @transform_1, window_bounds = array<i64: 36, 128>}, {transform_indices = @transform_2, window_bounds = array<i64: 256, 128>}, {pipeline_mode = #tpu.pipeline_mode<synchronous>, transform_indices = @transform_3, window_bounds = array<i64: 1, 128>}, {pipeline_mode = #tpu.pipeline_mode<synchronous>, transform_indices = @transform_4, window_bounds = array<i64: 1, 128>}]} {
    %c0 = arith.constant 0 : index
    %c0_0 = arith.constant 0 : index
    %0 = vector.load %arg1[%c0, %c0_0] : memref<256x36xbf16, #tpu.memory_space<vmem>>, vector<256x36xbf16>
    %c0_1 = arith.constant 0 : index
    %c0_2 = arith.constant 0 : index
    %1 = vector.load %arg2[%c0_1, %c0_2] : memref<36x128xbf16, #tpu.memory_space<vmem>>, vector<36x128xbf16>
    %cst = arith.constant dense<0.000000e+00> : vector<256x128xf32>
    %2 = tpu.matmul %0, %1, %cst {dimension_numbers = #tpu.dot_dimension_numbers<[1], [0], [0], [1], [0, 0, 1, 1], [], []>} : vector<256x36xbf16>, vector<36x128xbf16>, vector<256x128xf32> -> vector<256x128xf32>
    %c0_3 = arith.constant 0 : index
    %c0_4 = arith.constant 0 : index
    %3 = vector.load %arg3[%c0_3, %c0_4] : memref<256x128xf32, #tpu.memory_space<vmem>>, vector<256x128xf32>
    tpu.vector_store %arg3[%c0_3, %c0_4], %2 {strides = array<i32>} : memref<256x128xf32, #tpu.memory_space<vmem>>, vector<256x128xf32>,
    %cst_5 = arith.constant dense<0.000000e+00> : vector<128xf32>
    %4 = vector.multi_reduction <add>, %2, %cst_5 [0] : vector<256x128xf32> to vector<128xf32>
    %5 = vector.shape_cast %4 : vector<128xf32> to vector<1x128xf32>
    %6 = arith.mulf %2, %2 : vector<256x128xf32>
    %cst_6 = arith.constant dense<0.000000e+00> : vector<128xf32>
    %7 = vector.multi_reduction <add>, %6, %cst_6 [0] : vector<256x128xf32> to vector<128xf32>
    %8 = vector.shape_cast %7 : vector<128xf32> to vector<1x128xf32>
    %c0_i32 = arith.constant 0 : i32
    %9 = arith.cmpi eq, %arg0, %c0_i32 : i32
    %10 = arith.extui %9 : i1 to i32
    %c0_i32_7 = arith.constant 0 : i32
    %11 = arith.cmpi ne, %10, %c0_i32_7 : i32
    scf.if %11 {
      %c0_10 = arith.constant 0 : index
      %c0_11 = arith.constant 0 : index
      %15 = vector.load %arg4[%c0_10, %c0_11] : memref<1x128xf32, #tpu.memory_space<vmem>>, vector<1x128xf32>
      tpu.vector_store %arg4[%c0_10, %c0_11], %5 {strides = array<i32>} : memref<1x128xf32, #tpu.memory_space<vmem>>, vector<1x128xf32>,
      %c0_12 = arith.constant 0 : index
      %c0_13 = arith.constant 0 : index
      %16 = vector.load %arg5[%c0_12, %c0_13] : memref<1x128xf32, #tpu.memory_space<vmem>>, vector<1x128xf32>
      tpu.vector_store %arg5[%c0_12, %c0_13], %8 {strides = array<i32>} : memref<1x128xf32, #tpu.memory_space<vmem>>, vector<1x128xf32>,
    } else {
    }
    %c0_i32_8 = arith.constant 0 : i32
    %12 = arith.cmpi sgt, %arg0, %c0_i32_8 : i32
    %13 = arith.extui %12 : i1 to i32
    %c0_i32_9 = arith.constant 0 : i32
    %14 = arith.cmpi ne, %13, %c0_i32_9 : i32
    scf.if %14 {
      %c0_10 = arith.constant 0 : index
      %c0_11 = arith.constant 0 : index
      %15 = vector.load %arg4[%c0_10, %c0_11] : memref<1x128xf32, #tpu.memory_space<vmem>>, vector<1x128xf32>
      %16 = arith.addf %15, %5 : vector<1x128xf32>
      %c0_12 = arith.constant 0 : index
      %c0_13 = arith.constant 0 : index
      %17 = vector.load %arg4[%c0_12, %c0_13] : memref<1x128xf32, #tpu.memory_space<vmem>>, vector<1x128xf32>
      tpu.vector_store %arg4[%c0_12, %c0_13], %16 {strides = array<i32>} : memref<1x128xf32, #tpu.memory_space<vmem>>, vector<1x128xf32>,
      %c0_14 = arith.constant 0 : index
      %c0_15 = arith.constant 0 : index
      %18 = vector.load %arg5[%c0_14, %c0_15] : memref<1x128xf32, #tpu.memory_space<vmem>>, vector<1x128xf32>
      %19 = arith.addf %18, %8 : vector<1x128xf32>
      %c0_16 = arith.constant 0 : index
      %c0_17 = arith.constant 0 : index
      %20 = vector.load %arg5[%c0_16, %c0_17] : memref<1x128xf32, #tpu.memory_space<vmem>>, vector<1x128xf32>
      tpu.vector_store %arg5[%c0_16, %c0_17], %19 {strides = array<i32>} : memref<1x128xf32, #tpu.memory_space<vmem>>, vector<1x128xf32>,
    } else {
    }
    return
  }
  func.func @transform_0(%arg0: i32) -> (i32, i32) {
    %c0_i32 = arith.constant 0 : i32
    %c0_i32_0 = arith.constant 0 : i32
    return %arg0, %c0_i32 : i32, i32
  }
  func.func @transform_1(%arg0: i32) -> (i32, i32) {
    %c0_i32 = arith.constant 0 : i32
    %c0_i32_0 = arith.constant 0 : i32
    %c0_i32_1 = arith.constant 0 : i32
    return %c0_i32, %c0_i32_0 : i32, i32
  }
  func.func @transform_2(%arg0: i32) -> (i32, i32) {
    %c0_i32 = arith.constant 0 : i32
    %c0_i32_0 = arith.constant 0 : i32
    return %arg0, %c0_i32 : i32, i32
  }
  func.func @transform_3(%arg0: i32) -> (i32, i32) {
    %c0_i32 = arith.constant 0 : i32
    %c0_i32_0 = arith.constant 0 : i32
    %c0_i32_1 = arith.constant 0 : i32
    return %c0_i32, %c0_i32_0 : i32, i32
  }
  func.func @transform_4(%arg0: i32) -> (i32, i32) {
    %c0_i32 = arith.constant 0 : i32
    %c0_i32_0 = arith.constant 0 : i32
    %c0_i32_1 = arith.constant 0 : i32
    return %c0_i32, %c0_i32_0 : i32, i32
  }
}

module attributes {stable_mosaic.version = 11 : i64} {
  func.func @bn_apply_kernel(%arg0: i32, %arg1: memref<256x128xf32, #tpu.memory_space<vmem>>, %arg2: memref<1x128xf32, #tpu.memory_space<vmem>>, %arg3: memref<1x128xf32, #tpu.memory_space<vmem>>, %arg4: memref<256x128xf32, #tpu.memory_space<vmem>>) attributes {dimension_semantics = [#tpu.dimension_semantics<parallel>], iteration_bounds = array<i64: 2>, scalar_prefetch = 0 : i64, scratch_operands = 0 : i64, tpu.core_type = #tpu.core_type<tc>, window_params = [{transform_indices = @transform_0, window_bounds = array<i64: 256, 128>}, {pipeline_mode = #tpu.pipeline_mode<synchronous>, transform_indices = @transform_1, window_bounds = array<i64: 1, 128>}, {pipeline_mode = #tpu.pipeline_mode<synchronous>, transform_indices = @transform_2, window_bounds = array<i64: 1, 128>}, {transform_indices = @transform_3, window_bounds = array<i64: 256, 128>}]} {
    %c0 = arith.constant 0 : index
    %c0_0 = arith.constant 0 : index
    %0 = vector.load %arg1[%c0, %c0_0] : memref<256x128xf32, #tpu.memory_space<vmem>>, vector<256x128xf32>
    %c0_1 = arith.constant 0 : index
    %c0_2 = arith.constant 0 : index
    %1 = vector.load %arg2[%c0_1, %c0_2] : memref<1x128xf32, #tpu.memory_space<vmem>>, vector<1x128xf32>
    %2 = vector.broadcast %1 : vector<1x128xf32> to vector<256x128xf32>
    %3 = arith.mulf %0, %2 : vector<256x128xf32>
    %c0_3 = arith.constant 0 : index
    %c0_4 = arith.constant 0 : index
    %4 = vector.load %arg3[%c0_3, %c0_4] : memref<1x128xf32, #tpu.memory_space<vmem>>, vector<1x128xf32>
    %5 = vector.broadcast %4 : vector<1x128xf32> to vector<256x128xf32>
    %6 = arith.addf %3, %5 : vector<256x128xf32>
    %c0_5 = arith.constant 0 : index
    %c0_6 = arith.constant 0 : index
    %7 = vector.load %arg4[%c0_5, %c0_6] : memref<256x128xf32, #tpu.memory_space<vmem>>, vector<256x128xf32>
    tpu.vector_store %arg4[%c0_5, %c0_6], %6 {strides = array<i32>} : memref<256x128xf32, #tpu.memory_space<vmem>>, vector<256x128xf32>,
    return
  }
  func.func @transform_0(%arg0: i32) -> (i32, i32) {
    %c0_i32 = arith.constant 0 : i32
    %c0_i32_0 = arith.constant 0 : i32
    return %arg0, %c0_i32 : i32, i32
  }
  func.func @transform_1(%arg0: i32) -> (i32, i32) {
    %c0_i32 = arith.constant 0 : i32
    %c0_i32_0 = arith.constant 0 : i32
    %c0_i32_1 = arith.constant 0 : i32
    return %c0_i32, %c0_i32_0 : i32, i32
  }
  func.func @transform_2(%arg0: i32) -> (i32, i32) {
    %c0_i32 = arith.constant 0 : i32
    %c0_i32_0 = arith.constant 0 : i32
    %c0_i32_1 = arith.constant 0 : i32
    return %c0_i32, %c0_i32_0 : i32, i32
  }
  func.func @transform_3(%arg0: i32) -> (i32, i32) {
    %c0_i32 = arith.constant 0 : i32
    %c0_i32_0 = arith.constant 0 : i32
    return %arg0, %c0_i32 : i32, i32
  }
}

</mosaic_0001>

<bundles_post_ra>
// kernel: cnn_block_forward.3
= control target key start
LH: loop header
LB: loop body
LE: loop exit
PB: predicated region body
PF: predicated region fallthrough
CT: control target
= control target key end

     0   :  { %s421_s12 = smov 0   ;;  %s580_s0 = inlined_call_operand.vmem [shape: f32[512,128], index: 0, kind: input, shape index: {}]   ;;  %s581_s1 = inlined_call_operand.vmem [shape: f32[1,128], index: 1, kind: input, shape index: {}]   ;;  %s582_s2 = inlined_call_operand.vmem [shape: f32[1,128], index: 2, kind: input, shape index: {}]   ;;  %s583_s3 = inlined_call_operand.vmem [shape: f32[512,128], index: 3, kind: output, shape index: {}]  }
   0x1 LB: > { %s372_s13 = sadd.s32 4294967295, %s399_s12   ;;  %p376_p0 = scmp.ge.s32.totalorder %s399_s12, 1  ;;  %s399_s12 = sphi %s421_s12, %s13_s12  }
   0x2   : > { %p138_p1 = scmp.lt.s32.totalorder %s399_s12, 3 }
   0x4   : > { %p139_p2 = pnand %p376_p0, %p138_p1 }
   0x5   : > { %s377_s14 = sshll.u32 (!%p139_p2), %s372_s13, 5 }
   0x6   : > { %142 = sbr.rel (%p139_p2) target bundleno = 38 (0x26), region = 32  ;;  %p163_p3 = scmp.lt.s32.totalorder (!%p139_p2), %s377_s14, 63 }
   0xb   : > { %s585_s14 = smov (!%p163_p3, %s377_s14), 63  ;;  %v432_v0 = vld [vmem:[%s581_s1] ss:$0 sm:$0xff] }
   0xc   : > { %s378_s15 = sshll.u32 %s585_s14, 3  ;;  %v442_v1 = vld [vmem:[%s582_s2] ss:$0 sm:$0xff] }
   0xd   : > { %s437_s20 = scalar_lea.vmem %s580_s0, %s378_s15  ;;  %s456_s25 = scalar_lea.vmem %s583_s3, %s378_s15 }
   0xe   : > { %v174_v2 = vld [vmem:[%s437_s20] sm:$0xff]  ;;  %v175_v3 = vld [vmem:[%s437_s20 + $0x8] sm:$0xff]  ;;  %v176_v4 = vld [vmem:[%s437_s20 + $0x10] sm:$0xff] }
   0xf   : > { %v213_v5 = vmul.f32 %v432_v0, %v174_v2  ;;  %v214_v6 = vmul.f32 %v432_v0, %v175_v3  ;;  %v215_v7 = vmul.f32 %v432_v0, %v176_v4  ;;  %v177_v8 = vld [vmem:[%s437_s20 + $0x18] sm:$0xff]  ;;  %v178_v9 = vld [vmem:[%s437_s20 + $0x20] sm:$0xff]  ;;  %v179_v10 = vld [vmem:[%s437_s20 + $0x28] sm:$0xff] }
  0x10   : > { %v216_v11 = vmul.f32 %v432_v0, %v177_v8  ;;  %v217_v12 = vmul.f32 %v432_v0, %v178_v9  ;;  %v218_v13 = vmul.f32 %v432_v0, %v179_v10  ;;  %v180_v14 = vld [vmem:[%s437_s20 + $0x30] sm:$0xff]  ;;  %v181_v15 = vld [vmem:[%s437_s20 + $0x38] sm:$0xff]  ;;  %v182_v16 = vld [vmem:[%s437_s20 + $0x40] sm:$0xff] }
  0x11   : > { %v252_v17 = vadd.f32 %v442_v1, %v213_v5  ;;  %v253_v18 = vadd.f32 %v442_v1, %v214_v6  ;;  %v254_v19 = vadd.f32 %v442_v1, %v215_v7  ;;  %v219_v20 = vmul.f32 %v432_v0, %v180_v14  ;;  %v183_v21 = vld [vmem:[%s437_s20 + $0x48] sm:$0xff]  ;;  %v184_v22 = vld [vmem:[%s437_s20 + $0x50] sm:$0xff]  ;;  %v185_v23 = vld [vmem:[%s437_s20 + $0x58] sm:$0xff] }
  0x12   : > { %v255_v24 = vadd.f32 %v442_v1, %v216_v11  ;;  %v256_v25 = vadd.f32 %v442_v1, %v217_v12  ;;  %v257_v26 = vadd.f32 %v442_v1, %v218_v13  ;;  %v220_v27 = vmul.f32 %v432_v0, %v181_v15  ;;  %v186_v28 = vld [vmem:[%s437_s20 + $0x60] sm:$0xff]  ;;  %v187_v29 = vld [vmem:[%s437_s20 + $0x68] sm:$0xff]  ;;  %v188_v30 = vld [vmem:[%s437_s20 + $0x70] sm:$0xff] }
  0x13   : > { %284 = vst [vmem:[%s456_s25] sm:$0xff] %v252_v17  ;;  %285 = vst [vmem:[%s456_s25 + $0x8] sm:$0xff] %v253_v18  ;;  %v258_v31 = vadd.f32 %v442_v1, %v219_v20  ;;  %v221_v32 = vmul.f32 %v432_v0, %v182_v16  ;;  %v222_v33 = vmul.f32 %v432_v0, %v183_v21  ;;  %v189_v35 = vld [vmem:[%s437_s20 + $0x78] sm:$0xff]  ;;  %v190_v40 = vld [vmem:[%s437_s20 + $0x80] sm:$0xff] }
  0x14   : > { %286 = vst [vmem:[%s456_s25 + $0x10] sm:$0xff] %v254_v19  ;;  %v223_v34 = vmul.f32 %v432_v0, %v184_v22  ;;  %287 = vst [vmem:[%s456_s25 + $0x18] sm:$0xff] %v255_v24  ;;  %v259_v36 = vadd.f32 %v442_v1, %v220_v27  ;;  %v224_v37 = vmul.f32 %v432_v0, %v185_v23  ;;  %v191_v41 = vld [vmem:[%s437_s20 + $0x88] sm:$0xff]  ;;  %v192_v42 = vld [vmem:[%s437_s20 + $0x90] sm:$0xff] }
  0x15   : > { %288 = vst [vmem:[%s456_s25 + $0x20] sm:$0xff] %v256_v25  ;;  %289 = vst [vmem:[%s456_s25 + $0x28] sm:$0xff] %v257_v26  ;;  %v225_v38 = vmul.f32 %v432_v0, %v186_v28  ;;  %v226_v39 = vmul.f32 %v432_v0, %v187_v29  ;;  %v260_v43 = vadd.f32 %v442_v1, %v221_v32  ;;  %v193_v47 = vld [vmem:[%s437_s20 + $0x98] sm:$0xff]  ;;  %v194_v48 = vld [vmem:[%s437_s20 + $0xa0] sm:$0xff] }
  0x16   : > { %290 = vst [vmem:[%s456_s25 + $0x30] sm:$0xff] %v258_v31  ;;  %v261_v44 = vadd.f32 %v442_v1, %v222_v33  ;;  %v262_v45 = vadd.f32 %v442_v1, %v223_v34  ;;  %v227_v46 = vmul.f32 %v432_v0, %v188_v30  ;;  %v195_v49 = vld [vmem:[%s437_s20 + $0xa8] sm:$0xff]  ;;  %291 = vst [vmem:[%s456_s25 + $0x38] sm:$0xff] %v259_v36  ;;  %v196_v54 = vld [vmem:[%s437_s20 + $0xb0] sm:$0xff] }
  0x17   : > { %v263_v50 = vadd.f32 %v442_v1, %v224_v37  ;;  %v264_v51 = vadd.f32 %v442_v1, %v225_v38  ;;  %v265_v52 = vadd.f32 %v442_v1, %v226_v39  ;;  %v228_v53 = vmul.f32 %v432_v0, %v189_v35  ;;  %292 = vst [vmem:[%s456_s25 + $0x40] sm:$0xff] %v260_v43  ;;  %v197_v59 = vld [vmem:[%s437_s20 + $0xb8] sm:$0xff]  ;;  %v198_v2 = vld [vmem:[%s437_s20 + $0xc0] sm:$0xff]  ;;  %v199_v3 = vld [vmem:[%s437_s20 + $0xc8] sm:$0xff] }
  0x18   : > { %293 = vst [vmem:[%s456_s25 + $0x48] sm:$0xff] %v261_v44  ;;  %294 = vst [vmem:[%s456_s25 + $0x50] sm:$0xff] %v262_v45  ;;  %v266_v55 = vadd.f32 %v442_v1, %v227_v46  ;;  %v229_v56 = vmul.f32 %v432_v0, %v190_v40  ;;  %v230_v57 = vmul.f32 %v432_v0, %v191_v41  ;;  %v200_v4 = vld [vmem:[%s437_s20 + $0xd0] sm:$0xff]  ;;  %v201_v9 = vld [vmem:[%s437_s20 + $0xd8] sm:$0xff] }
  0x19   : > { %v231_v58 = vmul.f32 %v432_v0, %v192_v42  ;;  %295 = vst [vmem:[%s456_s25 + $0x58] sm:$0xff] %v263_v50  ;;  %296 = vst [vmem:[%s456_s25 + $0x60] sm:$0xff] %v264_v51  ;;  %v267_v60 = vadd.f32 %v442_v1, %v228_v53  ;;  %v232_v61 = vmul.f32 %v432_v0, %v193_v47  ;;  %v202_v10 = vld [vmem:[%s437_s20 + $0xe0] sm:$0xff]  ;;  %v203_v11 = vld [vmem:[%s437_s20 + $0xe8] sm:$0xff] }
  0x1a   : > { %297 = vst [vmem:[%s456_s25 + $0x68] sm:$0xff] %v265_v52  ;;  %v233_v62 = vmul.f32 %v432_v0, %v194_v48  ;;  %v234_v63 = vmul.f32 %v432_v0, %v195_v49  ;;  %298 = vst [vmem:[%s456_s25 + $0x70] sm:$0xff] %v266_v55  ;;  %v268_v5 = vadd.f32 %v442_v1, %v229_v56  ;;  %v204_v16 = vld [vmem:[%s437_s20 + $0xf0] sm:$0xff]  ;;  %v205_v21 = vld [vmem:[%s437_s20 + $0xf8] sm:$0xff] }
  0x1b   : > { %v269_v6 = vadd.f32 %v442_v1, %v230_v57  ;;  %v270_v7 = vadd.f32 %v442_v1, %v231_v58  ;;  %v235_v8 = vmul.f32 %v432_v0, %v196_v54  ;;  %299 = vst [vmem:[%s456_s25 + $0x78] sm:$0xff] %v267_v60  ;;  %v271_v12 = vadd.f32 %v442_v1, %v232_v61 }
  0x1c   : > { %v272_v13 = vadd.f32 %v442_v1, %v233_v62  ;;  %v273_v14 = vadd.f32 %v442_v1, %v234_v63  ;;  %v236_v15 = vmul.f32 %v432_v0, %v197_v59  ;;  %300 = vst [vmem:[%s456_s25 + $0x80] sm:$0xff] %v268_v5  ;;  %v237_v18 = vmul.f32 %v432_v0, %v198_v2 }
  0x1d   : > { %301 = vst [vmem:[%s456_s25 + $0x88] sm:$0xff] %v269_v6  ;;  %302 = vst [vmem:[%s456_s25 + $0x90] sm:$0xff] %v270_v7  ;;  %v274_v17 = vadd.f32 %v442_v1, %v235_v8  ;;  %v238_v19 = vmul.f32 %v432_v0, %v199_v3  ;;  %v239_v20 = vmul.f32 %v432_v0, %v200_v4 }
  0x1e   : > { %303 = vst [vmem:[%s456_s25 + $0x98] sm:$0xff] %v271_v12  ;;  %304 = vst [vmem:[%s456_s25 + $0xa0] sm:$0xff] %v272_v13  ;;  %v275_v22 = vadd.f32 %v442_v1, %v236_v15  ;;  %v240_v23 = vmul.f32 %v432_v0, %v201_v9  ;;  %v241_v24 = vmul.f32 %v432_v0, %v202_v10 }
  0x1f   : > { %305 = vst [vmem:[%s456_s25 + $0xa8] sm:$0xff] %v273_v14  ;;  %v242_v25 = vmul.f32 %v432_v0, %v203_v11  ;;  %306 = vst [vmem:[%s456_s25 + $0xb0] sm:$0xff] %v274_v17  ;;  %v276_v26 = vadd.f32 %v442_v1, %v237_v18  ;;  %v277_v27 = vadd.f32 %v442_v1, %v238_v19 }
  0x20   : > { %v278_v28 = vadd.f32 %v442_v1, %v239_v20  ;;  %v243_v29 = vmul.f32 %v432_v0, %v204_v16  ;;  %307 = vst [vmem:[%s456_s25 + $0xb8] sm:$0xff] %v275_v22  ;;  %v279_v30 = vadd.f32 %v442_v1, %v240_v23  ;;  %v280_v31 = vadd.f32 %v442_v1, %v241_v24 }
  0x21   : > { %v281_v32 = vadd.f32 %v442_v1, %v242_v25  ;;  %v244_v33 = vmul.f32 %v432_v0, %v205_v21  ;;  %308 = vst [vmem:[%s456_s25 + $0xc0] sm:$0xff] %v276_v26  ;;  %309 = vst [vmem:[%s456_s25 + $0xc8] sm:$0xff] %v277_v27 }
  0x22   : > { %310 = vst [vmem:[%s456_s25 + $0xd0] sm:$0xff] %v278_v28  ;;  %v282_v34 = vadd.f32 %v442_v1, %v243_v29  ;;  %311 = vst [vmem:[%s456_s25 + $0xd8] sm:$0xff] %v279_v30 }
  0x23   : > { %312 = vst [vmem:[%s456_s25 + $0xe0] sm:$0xff] %v280_v31  ;;  %313 = vst [vmem:[%s456_s25 + $0xe8] sm:$0xff] %v281_v32  ;;  %v283_v35 = vadd.f32 %v442_v1, %v244_v33 }
  0x24   : > { %314 = vst [vmem:[%s456_s25 + $0xf0] sm:$0xff] %v282_v34 }
  0x25   : > { %315 = vst [vmem:[%s456_s25 + $0xf8] sm:$0xff] %v283_v35 }
  0x26 PF: > { %s13_s12 = sadd.s32 1, %s399_s12  }
  0x27   : > { %p10_p4 = scmp.ge.s32.totalorder %s13_s12, 4  }
  0x29   :  { %12 = sbr.rel (!%p10_p4) target bundleno = 1 (0x1), region = 62 }

// kernel: cnn_block_forward.2
= control target key start
LH: loop header
LB: loop body
LE: loop exit
PB: predicated region body
PF: predicated region fallthrough
CT: control target
= control target key end

     0   :  { %s938_s15 = smov 0   ;;  %s1125_s0 = inlined_call_operand.vmem [shape: bf16[512,36], index: 0, kind: input, shape index: {}]   ;;  %s1126_s1 = inlined_call_operand.vmem [shape: bf16[36,128], index: 1, kind: input, shape index: {}]   ;;  %s1127_s2 = inlined_call_operand.vmem [shape: f32[512,128], index: 2, kind: output, shape index: {0}]   ;;  %s1128_s3 = inlined_call_operand.vmem [shape: f32[1,128], index: 3, kind: output, shape index: {1}]   ;;  %s1129_s4 = inlined_call_operand.vmem [shape: f32[1,128], index: 4, kind: output, shape index: {2}]  }
   0x1 LB: > { %s944_s16 = sadd.s32 4294967295, %s911_s15   ;;  %p769_p0 = scmp.ge.s32.totalorder %s911_s15, 1  ;;  %s911_s15 = sphi %s938_s15, %s15_s15  }
   0x2   : > { %p158_p1 = scmp.lt.s32.totalorder %s911_s15, 3 }
   0x4   : > { %p159_p2 = pnand %p769_p0, %p158_p1 }
   0x5   : > { %s770_s21 = sshll.u32 (!%p159_p2), %s944_s16, 5  ;;  %p809_p4 = scmp.ne.s32.totalorder (!%p159_p2), %s944_s16, 0 }
   0x6   : > { %162 = sbr.rel (%p159_p2) target bundleno = 312 (0x138), region = 28  ;;  %p185_p3 = scmp.lt.s32.totalorder (!%p159_p2), %s770_s21, 63 }
   0xb   : > { %v886_v0 = vld [vmem:[%s1126_s1 + $0x10] ss:$0 sps:$4 sm:$0x33]   ;;  %vm378_vm0 = vcmask 1041408   ;;  %v887_v1 = vld [vmem:[%s1126_s1 + $0x8] sm:$0xff]   ;;  %v888_v3 = vld [vmem:[%s1126_s1] sm:$0xff]  }
   0xc   : > { %876 = vmatprep.subr.msk.bf16.mxu0 %vm378_vm0, %v886_v0  ;;  %v380_v2 = vsel %vm378_vm0, %v886_v0, 0  ;;  %877 = vmatprep.subr.msk.bf16.mxu1 %vm378_vm0, %v886_v0  ;;  %s1131_s21 = smov (!%p185_p3, %s770_s21), 63  ;;  %vm329_vm1 = vcmask 293888  }
   0xd   : > { %833 = vmatpush3.bf16.msra.mxu0 %v380_v2  ;;  %873 = vmatpush3.bf16.msra.mxu1 %v380_v2  ;;  %s771_s24 = sshll.u32 %s1131_s21, 2  ;;  %s773_s28 = sshll.u32 %s1131_s21, 3 }
   0xe   : > { %834 = vmatprep.subr.bf16.mxu0 %v887_v1  ;;  %871 = vmatprep.subr.bf16.mxu1 %v887_v1  ;;  %s964_s27 = scalar_lea.vmem %s1125_s0, %s771_s24  ;;  %s1002_s5 = scalar_lea.vmem %s1127_s2, %s773_s28 }
   0xf   : > { %v889_v4 = vld [vmem:[%s964_s27] sm:$0xff]   ;;  %v890_v5 = vld [vmem:[%s964_s27 + $0x8] sm:$0xff]   ;;  %v891_v6 = vld [vmem:[%s964_s27 + $0x10] sm:$0xff]  }
  0x10   : > { %838 = vmatprep.mubr.msk.bf16.mxu0 %vm329_vm1, %v889_v4  ;;  %v892_v7 = vld [vmem:[%s964_s27 + $0x18] sm:$0xff]   ;;  %v893_v8 = vld [vmem:[%s964_s27 + $0x20] sm:$0xff]   ;;  %v898_v10 = vld [vmem:[%s964_s27 + $0x48] sm:$0xff]  }
  0x11   : > { %835 = vmatpush3.bf16.msra.mxu0 %v887_v1  ;;  %874 = vmatpush3.bf16.msra.mxu1 %v887_v1  ;;  %v897_v9 = vld [vmem:[%s964_s27 + $0x40] sm:$0xff]   ;;  %v899_v11 = vld [vmem:[%s964_s27 + $0x50] sm:$0xff]   ;;  %v900_v12 = vld [vmem:[%s964_s27 + $0x58] sm:$0xff]  }
  0x12   : > { %836 = vmatprep.subr.bf16.mxu0 %v888_v3  ;;  %872 = vmatprep.subr.bf16.mxu1 %v888_v3  ;;  %v901_v13 = vld [vmem:[%s964_s27 + $0x60] sm:$0xff]   ;;  %v894_v14 = vld [vmem:[%s964_s27 + $0x28] sm:$0xff]   ;;  %v895_v15 = vld [vmem:[%s964_s27 + $0x30] sm:$0xff]  }
  0x13   : > { %854 = vmatprep.mubr.msk.bf16.mxu1 %vm329_vm1, %v897_v9  ;;  %v902_v16 = vld [vmem:[%s964_s27 + $0x68] sm:$0xff]   ;;  %v903_v17 = vld [vmem:[%s964_s27 + $0x70] sm:$0xff]   ;;  %v896_v18 = vld [vmem:[%s964_s27 + $0x38] sm:$0xff]  }
  0x14   : > { %v904_v19 = vld [vmem:[%s964_s27 + $0x78] sm:$0xff]  }
  0x15   : > { %837 = vmatpush3.bf16.msra.mxu0 %v888_v3  ;;  %875 = vmatpush3.bf16.msra.mxu1 %v888_v3 }
  0x18   : > { %839 = vmatmul.mubr.msk.bf16.vlgmr.msra.gmra.mxu0 %vm329_vm1, %v890_v5  ;;  %855 = vmatmul.mubr.msk.bf16.vlgmr.msra.gmra.mxu1 %vm329_vm1, %v898_v10 }
  0x19   : > { %842 = vmatprep.mubr.msk.bf16.mxu0 %vm329_vm1, %v891_v6  ;;  %858 = vmatprep.mubr.msk.bf16.mxu1 %vm329_vm1, %v899_v11 }
  0x20   : > { %843 = vmatmul.mubr.msk.bf16.gmra.mxu0 %vm329_vm1, %v892_v7  ;;  %859 = vmatmul.mubr.msk.bf16.gmra.mxu1 %vm329_vm1, %v900_v12 }
  0x21   : > { %846 = vmatprep.mubr.msk.bf16.mxu0 %vm329_vm1, %v893_v8  ;;  %862 = vmatprep.mubr.msk.bf16.mxu1 %vm329_vm1, %v901_v13 }
  0x28   : > { %847 = vmatmul.mubr.msk.bf16.gmra.mxu0 %vm329_vm1, %v894_v14  ;;  %863 = vmatmul.mubr.msk.bf16.gmra.mxu1 %vm329_vm1, %v902_v16 }
  0x29   : > { %850 = vmatprep.mubr.msk.bf16.mxu0 %vm329_vm1, %v895_v15  ;;  %866 = vmatprep.mubr.msk.bf16.mxu1 %vm329_vm1, %v903_v17 }
  0x30   : > { %851 = vmatmul.mubr.msk.bf16.gmra.mxu0 %vm329_vm1, %v896_v18  ;;  %867 = vmatmul.mubr.msk.bf16.gmra.mxu1 %vm329_vm1, %v904_v19 }
  0xd8   : > { %v840_v20 = vpop.f32.mrf.mxu0  ;;  %v1007_v24 = vpop.f32.mrf.mxu1 }
  0xd9   : > { %545 = vst [vmem:[%s1002_s5 + $0x10] sm:$0xff] %v840_v20  ;;  %561 = vst [vmem:[%s1002_s5 + $0x90] sm:$0xff] %v1007_v24  ;;  %v614_v30 = vmul.f32 %v840_v20, %v840_v20 }
  0xda   : > { %v416_v21 = vpop.f32.mrf.mxu0  ;;  %v1012_v29 = vpop.f32.mrf.mxu1 }
  0xdb   : > { %543 = vst [vmem:[%s1002_s5] sm:$0xff] %v416_v21  ;;  %v612_v25 = vmul.f32 %v416_v21, %v416_v21  ;;  %559 = vst [vmem:[%s1002_s5 + $0x80] sm:$0xff] %v1012_v29 }
  0xdc   : > { %v841_v22 = vpop.f32.mrf.mxu0  ;;  %v1017_v34 = vpop.f32.mrf.mxu1 }
  0xdd   : > { %546 = vst [vmem:[%s1002_s5 + $0x18] sm:$0xff] %v841_v22  ;;  %v615_v35 = vmul.f32 %v841_v22, %v841_v22  ;;  %562 = vst [vmem:[%s1002_s5 + $0x98] sm:$0xff] %v1017_v34 }
  0xde   : > { %v419_v23 = vpop.f32.mrf.mxu0  ;;  %v1022_v39 = vpop.f32.mrf.mxu1 }
  0xdf   : > { %544 = vst [vmem:[%s1002_s5 + $0x8] sm:$0xff] %v419_v23  ;;  %v575_v26 = vadd.f32 %v419_v23, %v416_v21  ;;  %v613_v27 = vmul.f32 %v419_v23, %v419_v23  ;;  %560 = vst [vmem:[%s1002_s5 + $0x88] sm:$0xff] %v1022_v39 }
  0xe0   : > { %v844_v28 = vpop.f32.mrf.mxu0  ;;  %v1027_v44 = vpop.f32.mrf.mxu1 }
  0xe1   : > { %v576_v31 = vadd.f32 %v840_v20, %v575_v26  ;;  %v644_v32 = vadd.f32 %v613_v27, %v612_v25  ;;  %549 = vst [vmem:[%s1002_s5 + $0x30] sm:$0xff] %v844_v28  ;;  %565 = vst [vmem:[%s1002_s5 + $0xb0] sm:$0xff] %v1027_v44  ;;  %v618_v50 = vmul.f32 %v844_v28, %v844_v28 }
  0xe2   : > { %v432_v33 = vpop.f32.mrf.mxu0  ;;  %v1032_v49 = vpop.f32.mrf.mxu1 }
  0xe3   : > { %v645_v36 = vadd.f32 %v644_v32, %v614_v30  ;;  %547 = vst [vmem:[%s1002_s5 + $0x20] sm:$0xff] %v432_v33  ;;  %v577_v37 = vadd.f32 %v841_v22, %v576_v31  ;;  %v616_v41 = vmul.f32 %v432_v33, %v432_v33  ;;  %563 = vst [vmem:[%s1002_s5 + $0xa0] sm:$0xff] %v1032_v49 }
  0xe4   : > { %v845_v38 = vpop.f32.mrf.mxu0  ;;  %v1037_v54 = vpop.f32.mrf.mxu1 }
  0xe5   : > { %v578_v40 = vadd.f32 %v577_v37, %v432_v33  ;;  %v646_v42 = vadd.f32 %v645_v36, %v615_v35  ;;  %550 = vst [vmem:[%s1002_s5 + $0x38] sm:$0xff] %v845_v38  ;;  %v619_v55 = vmul.f32 %v845_v38, %v845_v38  ;;  %566 = vst [vmem:[%s1002_s5 + $0xb8] sm:$0xff] %v1037_v54 }
  0xe6   : > { %v435_v43 = vpop.f32.mrf.mxu0  ;;  %v1042_v59 = vpop.f32.mrf.mxu1  ;;  %v628_v36 = vmul.f32 %v1012_v29, %v1012_v29 }
  0xe7   : > { %v647_v45 = vadd.f32 %v646_v42, %v616_v41  ;;  %548 = vst [vmem:[%s1002_s5 + $0x28] sm:$0xff] %v435_v43  ;;  %v579_v46 = vadd.f32 %v578_v40, %v435_v43  ;;  %v617_v47 = vmul.f32 %v435_v43, %v435_v43  ;;  %564 = vst [vmem:[%s1002_s5 + $0xa8] sm:$0xff] %v1042_v59 }
  0xe8   : > { %v848_v48 = vpop.f32.mrf.mxu0  ;;  %v1047_v0 = vpop.f32.mrf.mxu1  ;;  %v629_v41 = vmul.f32 %v1022_v39, %v1022_v39  ;;  %v630_v43 = vmul.f32 %v1007_v24, %v1007_v24 }
  0xe9   : > { %v580_v51 = vadd.f32 %v844_v28, %v579_v46  ;;  %v648_v52 = vadd.f32 %v647_v45, %v617_v47  ;;  %553 = vst [vmem:[%s1002_s5 + $0x50] sm:$0xff] %v848_v48  ;;  %569 = vst [vmem:[%s1002_s5 + $0xd0] sm:$0xff] %v1047_v0  ;;  %v622_v6 = vmul.f32 %v848_v48, %v848_v48 }
  0xea   : > { %v448_v53 = vpop.f32.mrf.mxu0  ;;  %v1052_v5 = vpop.f32.mrf.mxu1  ;;  %v631_v47 = vmul.f32 %v1017_v34, %v1017_v34 }
  0xeb   : > { %v649_v56 = vadd.f32 %v648_v52, %v618_v50  ;;  %551 = vst [vmem:[%s1002_s5 + $0x40] sm:$0xff] %v448_v53  ;;  %v581_v57 = vadd.f32 %v845_v38, %v580_v51  ;;  %v620_v61 = vmul.f32 %v448_v53, %v448_v53  ;;  %567 = vst [vmem:[%s1002_s5 + $0xc0] sm:$0xff] %v1052_v5 }
  0xec   : > { %v849_v58 = vpop.f32.mrf.mxu0  ;;  %v1057_v10 = vpop.f32.mrf.mxu1  ;;  %v632_v51 = vmul.f32 %v1032_v49, %v1032_v49 }
  0xed   : > { %v582_v60 = vadd.f32 %v581_v57, %v448_v53  ;;  %v650_v62 = vadd.f32 %v649_v56, %v619_v55  ;;  %554 = vst [vmem:[%s1002_s5 + $0x58] sm:$0xff] %v849_v58  ;;  %v623_v11 = vmul.f32 %v849_v58, %v849_v58  ;;  %570 = vst [vmem:[%s1002_s5 + $0xd8] sm:$0xff] %v1057_v10 }
  0xee   : > { %v451_v63 = vpop.f32.mrf.mxu0  ;;  %v515_v15 = vpop.f32.mrf.mxu1  ;;  %v633_v55 = vmul.f32 %v1042_v59, %v1042_v59 }
  0xef   : > { %v651_v1 = vadd.f32 %v650_v62, %v620_v61  ;;  %552 = vst [vmem:[%s1002_s5 + $0x48] sm:$0xff] %v451_v63  ;;  %v583_v2 = vadd.f32 %v582_v60, %v451_v63  ;;  %v621_v3 = vmul.f32 %v451_v63, %v451_v63  ;;  %568 = vst [vmem:[%s1002_s5 + $0xc8] sm:$0xff] %v515_v15 }
  0xf0   : > { %v852_v4 = vpop.f32.mrf.mxu0  ;;  %v868_v20 = vpop.f32.mrf.mxu1  ;;  %v636_v61 = vmul.f32 %v1052_v5, %v1052_v5 }
  0xf1   : > { %v584_v7 = vadd.f32 %v848_v48, %v583_v2  ;;  %v652_v8 = vadd.f32 %v651_v1, %v621_v3  ;;  %557 = vst [vmem:[%s1002_s5 + $0x70] sm:$0xff] %v852_v4  ;;  %573 = vst [vmem:[%s1002_s5 + $0xf0] sm:$0xff] %v868_v20  ;;  %v626_v26 = vmul.f32 %v852_v4, %v852_v4 }
  0xf2   : > { %v464_v9 = vpop.f32.mrf.mxu0  ;;  %v528_v25 = vpop.f32.mrf.mxu1  ;;  %v637_v1 = vmul.f32 %v515_v15, %v515_v15  ;;  %v638_v2 = vmul.f32 %v1047_v0, %v1047_v0 }
  0xf3   : > { %v653_v12 = vadd.f32 %v652_v8, %v622_v6  ;;  %555 = vst [vmem:[%s1002_s5 + $0x60] sm:$0xff] %v464_v9  ;;  %v585_v13 = vadd.f32 %v849_v58, %v584_v7  ;;  %v624_v17 = vmul.f32 %v464_v9, %v464_v9  ;;  %571 = vst [vmem:[%s1002_s5 + $0xe0] sm:$0xff] %v528_v25 }
  0xf4   : > { %v853_v14 = vpop.f32.mrf.mxu0  ;;  %v869_v30 = vpop.f32.mrf.mxu1  ;;  %v640_v8 = vmul.f32 %v528_v25, %v528_v25 }
  0xf5   : > { %v586_v16 = vadd.f32 %v585_v13, %v464_v9  ;;  %v654_v18 = vadd.f32 %v653_v12, %v623_v11  ;;  %558 = vst [vmem:[%s1002_s5 + $0x78] sm:$0xff] %v853_v14  ;;  %v627_v31 = vmul.f32 %v853_v14, %v853_v14  ;;  %574 = vst [vmem:[%s1002_s5 + $0xf8] sm:$0xff] %v869_v30 }
  0xf6   : > { %v467_v19 = vpop.f32.mrf.mxu0  ;;  %v531_v35 = vpop.f32.mrf.mxu1  ;;  %v642_v13 = vmul.f32 %v868_v20, %v868_v20 }
  0xf7   : > { %v655_v21 = vadd.f32 %v654_v18, %v624_v17  ;;  %556 = vst [vmem:[%s1002_s5 + $0x68] sm:$0xff] %v467_v19  ;;  %v587_v22 = vadd.f32 %v586_v16, %v467_v19  ;;  %v625_v23 = vmul.f32 %v467_v19, %v467_v19  ;;  %572 = vst [vmem:[%s1002_s5 + $0xe8] sm:$0xff] %v531_v35 }
  0xf8   : > { %v641_v12 = vmul.f32 %v531_v35, %v531_v35  ;;  %v643_v16 = vmul.f32 %v869_v30, %v869_v30 }
  0xf9   : > { %v588_v27 = vadd.f32 %v852_v4, %v587_v22  ;;  %v656_v28 = vadd.f32 %v655_v21, %v625_v23  ;;  %v639_v4 = vmul.f32 %v1057_v10, %v1057_v10 }
  0xfb   : > { %v589_v32 = vadd.f32 %v853_v14, %v588_v27  ;;  %v657_v33 = vadd.f32 %v656_v28, %v626_v26 }
  0xfd   : > { %v658_v37 = vadd.f32 %v657_v33, %v627_v31  ;;  %v590_v38 = vadd.f32 %v589_v32, %v1012_v29 }
  0xff   : > { %v591_v40 = vadd.f32 %v590_v38, %v1022_v39  ;;  %v659_v42 = vadd.f32 %v658_v37, %v628_v36 }
 0x101   : > { %v592_v45 = vadd.f32 %v1007_v24, %v591_v40  ;;  %v660_v46 = vadd.f32 %v659_v42, %v629_v41  ;;  %v634_v24 = vmul.f32 %v1027_v44, %v1027_v44 }
 0x103   : > { %v661_v48 = vadd.f32 %v660_v46, %v630_v43  ;;  %v593_v50 = vadd.f32 %v1017_v34, %v592_v45  ;;  %v635_v34 = vmul.f32 %v1037_v54, %v1037_v54 }
 0x105   : > { %v594_v29 = vadd.f32 %v593_v50, %v1032_v49  ;;  %v662_v52 = vadd.f32 %v661_v48, %v631_v47 }
 0x107   : > { %v663_v39 = vadd.f32 %v662_v52, %v632_v51  ;;  %v595_v53 = vadd.f32 %v594_v29, %v1042_v59 }
 0x109   : > { %v596_v56 = vadd.f32 %v1027_v44, %v595_v53  ;;  %v664_v57 = vadd.f32 %v663_v39, %v633_v55 }
 0x10b   : > { %v665_v58 = vadd.f32 %v664_v57, %v634_v24  ;;  %v597_v60 = vadd.f32 %v1037_v54, %v596_v56 }
 0x10d   : > { %v598_v49 = vadd.f32 %v597_v60, %v1052_v5  ;;  %v666_v62 = vadd.f32 %v665_v58, %v635_v34 }
 0x10f   : > { %v667_v63 = vadd.f32 %v666_v62, %v636_v61  ;;  %v599_v59 = vadd.f32 %v598_v49, %v515_v15 }
 0x111   : > { %v600_v44 = vadd.f32 %v1047_v0, %v599_v59  ;;  %v668_v3 = vadd.f32 %v667_v63, %v637_v1 }
 0x113   : > { %v669_v6 = vadd.f32 %v668_v3, %v638_v2  ;;  %v601_v54 = vadd.f32 %v1057_v10, %v600_v44 }
 0x115   : > { %v602_v7 = vadd.f32 %v601_v54, %v528_v25  ;;  %v670_v9 = vadd.f32 %v669_v6, %v639_v4 }
 0x117   : > { %v671_v5 = vadd.f32 %v670_v9, %v640_v8  ;;  %v603_v11 = vadd.f32 %v602_v7, %v531_v35 }
 0x119   : > { %v604_v14 = vadd.f32 %v868_v20, %v603_v11  ;;  %v672_v15 = vadd.f32 %v671_v5, %v641_v12 }
 0x11b   : > { %v605_v17 = vadd.f32 %v869_v30, %v604_v14  ;;  %v673_v18 = vadd.f32 %v672_v15, %v642_v13 }
 0x11d   : > { %v606_v0 = vrot.slane %v605_v17, 4  ;;  %v674_v19 = vadd.f32 %v673_v18, %v643_v16 }
 0x11f   : > { %v607_v21 = vadd.f32 %v606_v0, %v605_v17  ;;  %v675_v22 = vrot.slane %v674_v19, 4 }
 0x121   : > { %v608_v23 = vrot.slane %v607_v21, 2  ;;  %v676_v26 = vadd.f32 %v675_v22, %v674_v19 }
 0x123   : > { %v609_v27 = vadd.f32 %v608_v23, %v607_v21  ;;  %v677_v10 = vrot.slane %v676_v26, 2 }
 0x125   : > { %v610_v28 = vrot.slane %v609_v27, 1  ;;  %v678_v25 = vadd.f32 %v677_v10, %v676_v26  ;;  %684 = sbr.rel (%p809_p4) target bundleno = 300 (0x12c), region = 32 }
 0x127   : > { %v611_v31 = vadd.f32 %v610_v28, %v609_v27  ;;  %v679_v32 = vrot.slane %v678_v25, 1 }
 0x129   : > { %v680_v33 = vadd.f32 %v679_v32, %v678_v25 }
 0x12a   : > { %685 = vst [vmem:[%s1128_s3] sm:$0x1] %v611_v31 }
 0x12b   : > { %686 = vst [vmem:[%s1129_s4] sm:$0x1] %v680_v33 }
 0x12c PF: > { %p810_p5 = scmp.le.s32.totalorder %s944_s16, 0 }
 0x12e   : > { %690 = sbr.rel (%p810_p5) target bundleno = 312 (0x138), region = 36 }
 0x133   : > { %v691_v20 = vld [vmem:[%s1128_s3] sm:$0x1] }
 0x134   : > { %v694_v30 = vld [vmem:[%s1129_s4] sm:$0x1]  ;;  %v692_v35 = vadd.f32 %v691_v20, %v611_v31 }
 0x135   : > { %v695_v36 = vadd.f32 %v694_v30, %v680_v33 }
 0x136   : > { %693 = vst [vmem:[%s1128_s3] sm:$0x1] %v692_v35 }
 0x137   : > { %696 = vst [vmem:[%s1129_s4] sm:$0x1] %v695_v36 }
 0x138 PF: > { %s15_s15 = sadd.s32 1, %s911_s15  }
 0x139   : > { %p12_p6 = scmp.ge.s32.totalorder %s15_s15, 4  }
 0x13b   :  { %14 = sbr.rel (!%p12_p6) target bundleno = 1 (0x1), region = 82 }

</bundles_post_ra>
